<compile_context>
chip_gen: v7x
topology: tpu7x:2x2x1
jax: 0.10.0
libtpu: 0.0.40
codegen_flags: <defaults>
</compile_context>

<pallas_src>
import jax
import jax.numpy as jnp
from jax import lax
from jax.experimental import pallas as pl
from jax.experimental.pallas import tpu as pltpu


def _make_kernel(Bp, E, G, C, PAD):
    """Kernel closure over static dims: Bp batch rows, E/G/C input widths, PAD=128."""
    bias_lane = E + G + C            # constant-1 carrier lane of the assembled input

    def kernel(emb_ref, genef_ref, chem_ref, w_ref, out_ref, x_scr):
        f32, bf16 = jnp.float32, jnp.bfloat16

        # ---- in-kernel concat + zero-pad + bias-carrier lane (no wrapper HLOs) ----
        # Single full store: zeros everywhere, 1.0 in the carrier lane.  Padded
        # lanes are therefore always finite (0 x anything stays 0 downstream).
        lane = lax.broadcasted_iota(jnp.int32, (Bp, PAD), 1)
        x_scr[...] = (lane == bias_lane).astype(f32)
        x_scr[:, 0:E] = emb_ref[...]
        x_scr[:, E:E + G] = genef_ref[...]
        x_scr[:, E + G:E + G + C] = chem_ref[...]

        x = x_scr[...].astype(bf16)

        # ---- 4 matmuls, all [Bp,128] x [128,128]; biases live in carrier lanes ----
        # Layer 0: fused block-diagonal branch Linears (+folded BN), ReLU.
        h = jnp.maximum(
            jnp.dot(x, w_ref[:, 0 * PAD:1 * PAD], preferred_element_type=f32), 0.0)
        # pred_head Linear(3*h1 -> h1) + folded BN, ReLU.  (concat is implicit:
        # h columns are already in [emb|genef|chem] branch order.)
        z1 = jnp.maximum(
            jnp.dot(h.astype(bf16), w_ref[:, 1 * PAD:2 * PAD],
                    preferred_element_type=f32), 0.0)
        # pred_head Linear(h1 -> h2), ReLU.
        z2 = jnp.maximum(
            jnp.dot(z1.astype(bf16), w_ref[:, 2 * PAD:3 * PAD],
                    preferred_element_type=f32), 0.0)
        # pred_head Linear(h2 -> out_dim), lane-dense padded output.
        out_ref[...] = jnp.dot(z2.astype(bf16), w_ref[:, 3 * PAD:4 * PAD],
                               preferred_element_type=f32)

    return kernel


def response_predictor(emb, genef, chemical, params):
    """params: packed dict from _init_params (single bf16 weight pack)."""
    w_pack = params["w_pack"]            # [128, 4*128] bf16
    out_dim = params["out_dim"]
    PAD = w_pack.shape[0]                # 128
    B = emb.shape[0]
    E, G, C = emb.shape[1], genef.shape[1], chemical.shape[1]

    # Sublane-align the batch (no-op when B % 8 == 0).
    Bp = ((B + 7) // 8) * 8
    if Bp != B:
        pad_rows = lambda a: jnp.pad(a, ((0, Bp - B), (0, 0)))
        emb, genef, chemical = pad_rows(emb), pad_rows(genef), pad_rows(chemical)

    kernel = _make_kernel(Bp, E, G, C, PAD)

    # TODO(synk): for batched serving (B >= 128 on v5e / >= 256 on v6e, v7x),
    # tile the batch with grid=(pl.cdiv(Bp, TB),), index emb/genef/chem/out by
    # the batch tile, keep w_pack on a constant index_map, and mark the axis
    # "parallel" so both v7x TensorCores get work.  At B=8 a single program is
    # the right shape and VMEM never binds (~0.3 MB total incl. double buffers).
    grid_spec = pltpu.PrefetchScalarGridSpec(
        num_scalar_prefetch=0,
        grid=(1,),
        in_specs=[
            pl.BlockSpec((Bp, E), lambda i: (0, 0)),
            pl.BlockSpec((Bp, G), lambda i: (0, 0)),
            pl.BlockSpec((Bp, C), lambda i: (0, 0)),
            pl.BlockSpec((PAD, 4 * PAD), lambda i: (0, 0)),
        ],
        out_specs=pl.BlockSpec((Bp, PAD), lambda i: (0, 0)),
        scratch_shapes=[pltpu.VMEM((Bp, PAD), jnp.float32)],
    )

    out_padded = pl.pallas_call(
        kernel,
        out_shape=jax.ShapeDtypeStruct((Bp, PAD), jnp.float32),
        grid_spec=grid_spec,
        compiler_params=pltpu.CompilerParams(
            dimension_semantics=("arbitrary",)),
    )(emb, genef, chemical, w_pack)

    # Lane-dense output from the kernel; this slice fuses into the consumer.
    return out_padded[:B, :out_dim]


# ----------------------------- parameter packing -----------------------------

def _fold_linear_bn(key, in_dim, out_dim, eps=1e-5):
    """Linear(in,out) + BatchNorm1d(out) eval-mode, folded into (W [in,out], c [out])."""
    k_w, k_b, k_g, k_beta, k_m, k_v = jax.random.split(key, 6)
    w = jax.random.normal(k_w, (in_dim, out_dim), jnp.float32) * 0.1
    b = jax.random.normal(k_b, (out_dim,), jnp.float32) * 0.1
    gamma = 1.0 + 0.1 * jax.random.normal(k_g, (out_dim,), jnp.float32)
    beta = 0.1 * jax.random.normal(k_beta, (out_dim,), jnp.float32)
    mean = 0.1 * jax.random.normal(k_m, (out_dim,), jnp.float32)
    var = 1.0 + 0.1 * jax.random.uniform(k_v, (out_dim,), jnp.float32)
    s = gamma / jnp.sqrt(var + eps)
    return w * s[None, :], (b - mean) * s + beta


def _linear(key, in_dim, out_dim):
    k_w, k_b = jax.random.split(key)
    w = jax.random.normal(k_w, (in_dim, out_dim), jnp.float32) * 0.1
    b = jax.random.normal(k_b, (out_dim,), jnp.float32) * 0.1
    return w, b


def _init_params(key, emb_dim, genef_dim, chemical_dim, h1, h2, out_dim, pad=128):
    """Returns (packed kernel params, unpacked f32 params for the reference)."""
    keys = jax.random.split(key, 6)
    we, ce = _fold_linear_bn(keys[0], emb_dim, h1)
    wg, cg = _fold_linear_bn(keys[1], genef_dim, h1)
    wc, cc = _fold_linear_bn(keys[2], chemical_dim, h1)
    w1, c1 = _fold_linear_bn(keys[3], 3 * h1, h1)      # pred_head Linear(3*h1->h1)+BN
    w2, b2 = _linear(keys[4], h1, h2)
    w3, b3 = _linear(keys[5], h2, out_dim)

    total_in = emb_dim + genef_dim + chemical_dim
    assert total_in + 1 <= pad and 3 * h1 + 1 <= pad and h1 + 1 <= pad and h2 + 1 <= pad
    x_carrier = total_in        # lane of x holding constant 1.0
    h_carrier = 3 * h1          # lane of h holding constant 1.0
    z1_carrier = h1
    z2_carrier = h2

    # Layer 0: block-diagonal fused branch weights; bias row at the x carrier lane.
    L0 = jnp.zeros((pad, pad), jnp.float32)
    row = 0
    for idx, (w, d) in enumerate(zip((we, wg, wc),
                                     (emb_dim, genef_dim, chemical_dim))):
        L0 = L0.at[row:row + d, idx * h1:(idx + 1) * h1].set(w)
        row += d
    cb = jnp.concatenate([ce, cg, cc])
    L0 = L0.at[x_carrier, :3 * h1].set(cb)
    L0 = L0.at[x_carrier, h_carrier].set(1.0)          # propagate the 1.0 to h

    # Layer 1: pred_head Linear(3*h1 -> h1) + folded BN.
    L1 = jnp.zeros((pad, pad), jnp.float32)
    L1 = L1.at[:3 * h1, :h1].set(w1)
    L1 = L1.at[h_carrier, :h1].set(c1)
    L1 = L1.at[h_carrier, z1_carrier].set(1.0)

    # Layer 2: Linear(h1 -> h2).
    L2 = jnp.zeros((pad, pad), jnp.float32)
    L2 = L2.at[:h1, :h2].set(w2)
    L2 = L2.at[z1_carrier, :h2].set(b2)
    L2 = L2.at[z1_carrier, z2_carrier].set(1.0)

    # Layer 3: Linear(h2 -> out_dim), lane-dense padded output columns.
    L3 = jnp.zeros((pad, pad), jnp.float32)
    L3 = L3.at[:h2, :out_dim].set(w3)
    L3 = L3.at[z2_carrier, :out_dim].set(b3)

    w_pack = jnp.concatenate([L0, L1, L2, L3], axis=1).astype(jnp.bfloat16)

    packed = {"w_pack": w_pack, "out_dim": out_dim}
    ref = {"we": we, "ce": ce, "wg": wg, "cg": cg, "wc": wc, "cc": cc,
           "w1": w1, "c1": c1, "w2": w2, "b2": b2, "w3": w3, "b3": b3}
    return packed, ref


def _reference(emb, genef, chemical, p):
    """Pure-JAX f32 reference of the original eval-mode forward pass."""
    relu = lambda x: jnp.maximum(x, 0.0)
    h_e = relu(emb @ p["we"] + p["ce"])
    h_g = relu(genef @ p["wg"] + p["cg"])
    h_c = relu(chemical @ p["wc"] + p["cc"])
    cat = jnp.concatenate([h_e, h_g, h_c], axis=1)
    z1 = relu(cat @ p["w1"] + p["c1"])
    z2 = relu(z1 @ p["w2"] + p["b2"])
    return z2 @ p["w3"] + p["b3"]


if __name__ == "__main__":
    B = 8
    emb_dim, genef_dim, chemical_dim = 32, 24, 16
    hidden_dim1, hidden_dim2, output_dim = 32, 16, 4

    key = jax.random.PRNGKey(0)
    k_e, k_g, k_c, k_p = jax.random.split(key, 4)
    emb = jax.random.normal(k_e, (B, emb_dim), jnp.float32)
    genef = jax.random.normal(k_g, (B, genef_dim), jnp.float32)
    chemical = jax.random.normal(k_c, (B, chemical_dim), jnp.float32)

    params, ref_params = _init_params(k_p, emb_dim, genef_dim, chemical_dim,
                                      hidden_dim1, hidden_dim2, output_dim)

    out = response_predictor(emb, genef, chemical, params)
    out = jax.block_until_ready(out)

    ref = _reference(emb, genef, chemical, ref_params)
    assert out.shape == (B, output_dim)
    # bf16 matmul operands / folded bf16 biases with f32 accumulation -> compare
    # against the pure-f32 reference with a correspondingly relaxed tolerance.
    assert jnp.allclose(out, ref, atol=5e-2, rtol=5e-2), \
        float(jnp.max(jnp.abs(out - ref)))

    print("KERNEL_OK")
</pallas_src>

<mosaic_0001>
module attributes {stable_mosaic.version = 11 : i64} {
  func.func @kernel(%arg0: i32, %arg1: memref<8x32xf32, #tpu.memory_space<vmem>>, %arg2: memref<8x24xf32, #tpu.memory_space<vmem>>, %arg3: memref<8x16xf32, #tpu.memory_space<vmem>>, %arg4: memref<128x512xbf16, #tpu.memory_space<vmem>>, %arg5: memref<8x128xf32, #tpu.memory_space<vmem>>, %arg6: memref<8x128xf32, #tpu.memory_space<vmem>>) attributes {dimension_semantics = [#tpu.dimension_semantics<arbitrary>], iteration_bounds = array<i64: 1>, scalar_prefetch = 0 : i64, scratch_operands = 1 : i64, tpu.core_type = #tpu.core_type<tc>, window_params = [{pipeline_mode = #tpu.pipeline_mode<synchronous>, transform_indices = @transform_0, window_bounds = array<i64: 8, 32>}, {pipeline_mode = #tpu.pipeline_mode<synchronous>, transform_indices = @transform_1, window_bounds = array<i64: 8, 24>}, {pipeline_mode = #tpu.pipeline_mode<synchronous>, transform_indices = @transform_2, window_bounds = array<i64: 8, 16>}, {pipeline_mode = #tpu.pipeline_mode<synchronous>, transform_indices = @transform_3, window_bounds = array<i64: 128, 512>}, {pipeline_mode = #tpu.pipeline_mode<synchronous>, transform_indices = @transform_4, window_bounds = array<i64: 8, 128>}]} {
    %0 = tpu.iota {dimensions = array<i32: 1>} : vector<8x128xi32>
    %c72_i32 = arith.constant 72 : i32
    %1 = vector.broadcast %c72_i32 : i32 to vector<8x128xi32>
    %2 = arith.cmpi eq, %0, %1 : vector<8x128xi32>
    %3 = arith.extui %2 : vector<8x128xi1> to vector<8x128xi32>
    %4 = arith.sitofp %3 : vector<8x128xi32> to vector<8x128xf32>
    %c0 = arith.constant 0 : index
    %c0_0 = arith.constant 0 : index
    %5 = vector.load %arg6[%c0, %c0_0] : memref<8x128xf32, #tpu.memory_space<vmem>>, vector<8x128xf32>
    tpu.vector_store %arg6[%c0, %c0_0], %4 {strides = array<i32>} : memref<8x128xf32, #tpu.memory_space<vmem>>, vector<8x128xf32>,
    %c0_1 = arith.constant 0 : index
    %c0_2 = arith.constant 0 : index
    %6 = vector.load %arg1[%c0_1, %c0_2] : memref<8x32xf32, #tpu.memory_space<vmem>>, vector<8x32xf32>
    %c0_3 = arith.constant 0 : index
    %c0_4 = arith.constant 0 : index
    %7 = vector.load %arg6[%c0_3, %c0_4] : memref<8x128xf32, #tpu.memory_space<vmem>>, vector<8x32xf32>
    tpu.vector_store %arg6[%c0_3, %c0_4], %6 {strides = array<i32>} : memref<8x128xf32, #tpu.memory_space<vmem>>, vector<8x32xf32>,
    %c0_5 = arith.constant 0 : index
    %c0_6 = arith.constant 0 : index
    %8 = vector.load %arg2[%c0_5, %c0_6] : memref<8x24xf32, #tpu.memory_space<vmem>>, vector<8x24xf32>
    %c0_7 = arith.constant 0 : index
    %c32 = arith.constant 32 : index
    %9 = vector.load %arg6[%c0_7, %c32] : memref<8x128xf32, #tpu.memory_space<vmem>>, vector<8x24xf32>
    tpu.vector_store %arg6[%c0_7, %c32], %8 {strides = array<i32>} : memref<8x128xf32, #tpu.memory_space<vmem>>, vector<8x24xf32>,
    %c0_8 = arith.constant 0 : index
    %c0_9 = arith.constant 0 : index
    %10 = vector.load %arg3[%c0_8, %c0_9] : memref<8x16xf32, #tpu.memory_space<vmem>>, vector<8x16xf32>
    %c0_10 = arith.constant 0 : index
    %c56 = arith.constant 56 : index
    %11 = vector.load %arg6[%c0_10, %c56] : memref<8x128xf32, #tpu.memory_space<vmem>>, vector<8x16xf32>
    tpu.vector_store %arg6[%c0_10, %c56], %10 {strides = array<i32>} : memref<8x128xf32, #tpu.memory_space<vmem>>, vector<8x16xf32>,
    %c0_11 = arith.constant 0 : index
    %c0_12 = arith.constant 0 : index
    %12 = vector.load %arg6[%c0_11, %c0_12] : memref<8x128xf32, #tpu.memory_space<vmem>>, vector<8x128xf32>
    %13 = arith.truncf %12 : vector<8x128xf32> to vector<8x128xbf16>
    %c0_13 = arith.constant 0 : index
    %c0_14 = arith.constant 0 : index
    %14 = vector.load %arg4[%c0_13, %c0_14] : memref<128x512xbf16, #tpu.memory_space<vmem>>, vector<128x128xbf16>
    %cst = arith.constant dense<0.000000e+00> : vector<8x128xf32>
    %15 = tpu.matmul %13, %14, %cst {dimension_numbers = #tpu.dot_dimension_numbers<[1], [0], [0], [1], [0, 0, 1, 1], [], []>} : vector<8x128xbf16>, vector<128x128xbf16>, vector<8x128xf32> -> vector<8x128xf32>
    %cst_15 = arith.constant 0.000000e+00 : f32
    %16 = vector.broadcast %cst_15 : f32 to vector<8x128xf32>
    %17 = arith.maximumf %15, %16 : vector<8x128xf32>
    %18 = arith.truncf %17 : vector<8x128xf32> to vector<8x128xbf16>
    %c0_16 = arith.constant 0 : index
    %c128 = arith.constant 128 : index
    %19 = vector.load %arg4[%c0_16, %c128] : memref<128x512xbf16, #tpu.memory_space<vmem>>, vector<128x128xbf16>
    %cst_17 = arith.constant dense<0.000000e+00> : vector<8x128xf32>
    %20 = tpu.matmul %18, %19, %cst_17 {dimension_numbers = #tpu.dot_dimension_numbers<[1], [0], [0], [1], [0, 0, 1, 1], [], []>} : vector<8x128xbf16>, vector<128x128xbf16>, vector<8x128xf32> -> vector<8x128xf32>
    %cst_18 = arith.constant 0.000000e+00 : f32
    %21 = vector.broadcast %cst_18 : f32 to vector<8x128xf32>
    %22 = arith.maximumf %20, %21 : vector<8x128xf32>
    %23 = arith.truncf %22 : vector<8x128xf32> to vector<8x128xbf16>
    %c0_19 = arith.constant 0 : index
    %c256 = arith.constant 256 : index
    %24 = vector.load %arg4[%c0_19, %c256] : memref<128x512xbf16, #tpu.memory_space<vmem>>, vector<128x128xbf16>
    %cst_20 = arith.constant dense<0.000000e+00> : vector<8x128xf32>
    %25 = tpu.matmul %23, %24, %cst_20 {dimension_numbers = #tpu.dot_dimension_numbers<[1], [0], [0], [1], [0, 0, 1, 1], [], []>} : vector<8x128xbf16>, vector<128x128xbf16>, vector<8x128xf32> -> vector<8x128xf32>
    %cst_21 = arith.constant 0.000000e+00 : f32
    %26 = vector.broadcast %cst_21 : f32 to vector<8x128xf32>
    %27 = arith.maximumf %25, %26 : vector<8x128xf32>
    %28 = arith.truncf %27 : vector<8x128xf32> to vector<8x128xbf16>
    %c0_22 = arith.constant 0 : index
    %c384 = arith.constant 384 : index
    %29 = vector.load %arg4[%c0_22, %c384] : memref<128x512xbf16, #tpu.memory_space<vmem>>, vector<128x128xbf16>
    %cst_23 = arith.constant dense<0.000000e+00> : vector<8x128xf32>
    %30 = tpu.matmul %28, %29, %cst_23 {dimension_numbers = #tpu.dot_dimension_numbers<[1], [0], [0], [1], [0, 0, 1, 1], [], []>} : vector<8x128xbf16>, vector<128x128xbf16>, vector<8x128xf32> -> vector<8x128xf32>
    %c0_24 = arith.constant 0 : index
    %c0_25 = arith.constant 0 : index
    %31 = vector.load %arg5[%c0_24, %c0_25] : memref<8x128xf32, #tpu.memory_space<vmem>>, vector<8x128xf32>
    tpu.vector_store %arg5[%c0_24, %c0_25], %30 {strides = array<i32>} : memref<8x128xf32, #tpu.memory_space<vmem>>, vector<8x128xf32>,
    return
  }
  func.func @transform_0(%arg0: i32) -> (i32, i32) {
    %c0_i32 = arith.constant 0 : i32
    %c0_i32_0 = arith.constant 0 : i32
    %c0_i32_1 = arith.constant 0 : i32
    return %c0_i32, %c0_i32_0 : i32, i32
  }
  func.func @transform_1(%arg0: i32) -> (i32, i32) {
    %c0_i32 = arith.constant 0 : i32
    %c0_i32_0 = arith.constant 0 : i32
    %c0_i32_1 = arith.constant 0 : i32
    return %c0_i32, %c0_i32_0 : i32, i32
  }
  func.func @transform_2(%arg0: i32) -> (i32, i32) {
    %c0_i32 = arith.constant 0 : i32
    %c0_i32_0 = arith.constant 0 : i32
    %c0_i32_1 = arith.constant 0 : i32
    return %c0_i32, %c0_i32_0 : i32, i32
  }
  func.func @transform_3(%arg0: i32) -> (i32, i32) {
    %c0_i32 = arith.constant 0 : i32
    %c0_i32_0 = arith.constant 0 : i32
    %c0_i32_1 = arith.constant 0 : i32
    return %c0_i32, %c0_i32_0 : i32, i32
  }
  func.func @transform_4(%arg0: i32) -> (i32, i32) {
    %c0_i32 = arith.constant 0 : i32
    %c0_i32_0 = arith.constant 0 : i32
    %c0_i32_1 = arith.constant 0 : i32
    return %c0_i32, %c0_i32_0 : i32, i32
  }
}

</mosaic_0001>

<bundles_post_ra>
// kernel: tpu_custom_call.1
= control target key start
LH: loop header
LB: loop body
LE: loop exit
PB: predicated region body
PF: predicated region fallthrough
CT: control target
= control target key end

     0   :  { %9 = vsyncpa [#allocation4], 0  ;;  %s987_s0 = inlined_call_operand.hbm [shape: f32[8,32], index: 0, kind: input, shape index: {}]   ;;  %s988_s1 = inlined_call_operand.hbm [shape: f32[8,24], index: 1, kind: input, shape index: {}]   ;;  %s989_s2 = inlined_call_operand.hbm [shape: f32[8,16], index: 2, kind: input, shape index: {}]   ;;  %s990_s3 = inlined_call_operand.hbm [shape: bf16[128,512], index: 3, kind: input, shape index: {}]   ;;  %s991_s4 = inlined_call_operand.hbm [shape: f32[8,128], index: 4, kind: output, shape index: {}]  }
   0x1   :  { %10 = vsyncpa [#allocation7], 0 }
   0x2   :  { %11 = vsyncpa [#allocation10], 0 }
   0x3   :  { %12 = vsyncpa [#allocation5], 0  ;;  %s843_s15 = smov [#allocation6]   ;;  %s844_s17 = smov [#allocation3]  }
   0x4   :  { %s29_s16 = sshll.u32 %s843_s15, 4  ;;  %s19_s18 = sshll.u32 %s844_s17, 4  ;;  %s30_s16 = int_to_ptr.vmem [resolvable:$true] %s29_s16  ;;  %s20_s18 = int_to_ptr.vmem [resolvable:$true] %s19_s18 }
   0x5   :  { %s725_s21 = scalar_lea.hbm %s988_s1, 128 }
   0x6   :  { %p726_p0 = scmp.ne.s32.totalorder %s988_s1, %s725_s21  ;;  %p729_p1 = scmp.lt.u32.totalorder %s725_s21, %s988_s1 }
   0x8   :  { %p731_p2 = pnand %p729_p1, %p726_p0 }
   0xa   :  { %734 = shalt.err (!%p731_p2)
}
   0xb   :  { %s735_s26 = scalar_lea.vmem %s30_s16, 128  ;;  %p740_p4 = scmp.lt.s32.totalorder %s30_s16, %s30_s16 }
   0xc   :  { %p736_p3 = scmp.ne.s32.totalorder %s30_s16, %s735_s26  ;;  %p741_p5 = scmp.lt.s32.totalorder %s735_s26, %s735_s26 }
   0xe   :  { %p742_p6 = por %p741_p5, %p740_p4 }
  0x10   :  { %p743_p7 = pnand %p742_p6, %p736_p3 }
  0x12   :  { %746 = shalt.err (!%p743_p7)
}
  0x13   :  { %32 = dma.hbm_to_vmem [thread:$0]  %s988_s1, 128, %s30_s16, [#allocation7]  }
  0x14   :  { %s747_s5 = scalar_lea.hbm %s987_s0, 128 }
  0x15   :  { %p748_p8 = scmp.ne.s32.totalorder %s987_s0, %s747_s5  ;;  %p751_p9 = scmp.lt.u32.totalorder %s747_s5, %s987_s0 }
  0x17   :  { %p753_p10 = pnand %p751_p9, %p748_p8 }
  0x19   :  { %756 = shalt.err (!%p753_p10)
}
  0x1a   :  { %s757_s10 = scalar_lea.vmem %s20_s18, 128  ;;  %p762_p12 = scmp.lt.s32.totalorder %s20_s18, %s20_s18 }
  0x1b   :  { %p758_p11 = scmp.ne.s32.totalorder %s20_s18, %s757_s10  ;;  %p763_p13 = scmp.lt.s32.totalorder %s757_s10, %s757_s10 }
  0x1d   :  { %p764_p0 = por %p763_p13, %p762_p12 }
  0x1f   :  { %p765_p1 = pnand %p764_p0, %p758_p11 }
  0x21   :  { %768 = shalt.err (!%p765_p1)
}
  0x22   :  { %22 = dma.hbm_to_vmem [thread:$0]  %s987_s0, 128, %s20_s18, [#allocation4]  }
  0x23   :  { %s845_s12 = smov [#allocation8]   ;;  %s846_s14 = smov [#allocation9]  }
  0x24   :  { %s39_s13 = sshll.u32 %s845_s12, 4  ;;  %s48_s15 = sshll.u32 %s846_s14, 4  ;;  %s40_s13 = int_to_ptr.vmem [resolvable:$true] %s39_s13  ;;  %s903_s15 = int_to_ptr.vmem [resolvable:$true] %s48_s15 }
  0x25   :  { %s769_s19 = scalar_lea.hbm %s989_s2, 128 }
  0x26   :  { %p770_p2 = scmp.ne.s32.totalorder %s989_s2, %s769_s19  ;;  %p773_p3 = scmp.lt.u32.totalorder %s769_s19, %s989_s2 }
  0x28   :  { %p775_p4 = pnand %p773_p3, %p770_p2 }
  0x2a   :  { %778 = shalt.err (!%p775_p4)
}
  0x2b   :  { %s779_s0 = scalar_lea.vmem %s40_s13, 128  ;;  %p784_p6 = scmp.lt.s32.totalorder %s40_s13, %s40_s13 }
  0x2c   :  { %p780_p5 = scmp.ne.s32.totalorder %s40_s13, %s779_s0  ;;  %p785_p7 = scmp.lt.s32.totalorder %s779_s0, %s779_s0 }
  0x2e   :  { %p786_p8 = por %p785_p7, %p784_p6 }
  0x30   :  { %p787_p9 = pnand %p786_p8, %p780_p5 }
  0x32   :  { %790 = shalt.err (!%p787_p9)
}
  0x33   :  { %42 = dma.hbm_to_vmem [thread:$0]  %s989_s2, 128, %s40_s13, [#allocation7]  }
  0x34   :  { %s791_s27 = scalar_lea.hbm %s990_s3, 4096 }
  0x35   :  { %p792_p10 = scmp.ne.s32.totalorder %s990_s3, %s791_s27  ;;  %p795_p11 = scmp.lt.u32.totalorder %s791_s27, %s990_s3 }
  0x37   :  { %p797_p12 = pnand %p795_p11, %p792_p10 }
  0x39   :  { %800 = shalt.err (!%p797_p12)
}
  0x3a   :  { %s801_s6 = scalar_lea.vmem %s903_s15, 4096  ;;  %p806_p0 = scmp.lt.s32.totalorder %s903_s15, %s903_s15 }
  0x3b   :  { %p802_p13 = scmp.ne.s32.totalorder %s903_s15, %s801_s6  ;;  %p807_p1 = scmp.lt.s32.totalorder %s801_s6, %s801_s6 }
  0x3d   :  { %p808_p2 = por %p807_p1, %p806_p0 }
  0x3f   :  { %p809_p3 = pnand %p808_p2, %p802_p13 }
  0x41   :  { %812 = shalt.err (!%p809_p3)
}
  0x42   :  { %s847_s2 = smov 256   ;;  %s848_s7 = smov 16  }
  0x43   :  { %54 = dma.hbm_to_vmem [thread:$0]  %s990_s3, 4096, %s903_s15, [#allocation10], %s847_s2, %s847_s2, %s848_s7  }
  0x44   :  { %835 = dma.done.wait [#allocation4], 128  }
  0x45   :  { %836 = vsyncadd [#allocation4], 4294967168 }
  0x46   :  { %837 = dma.done.wait [#allocation7], 256  }
  0x47   :  { %838 = vsyncadd [#allocation7], 4294967040 }
  0x48   :  { %839 = dma.done.wait [#allocation10], 4096  }
  0x49   :  { %840 = vsyncadd [#allocation10], 4294963200  ;;  %v68_v0 = vlaneseq  ;;  %v849_v1 = vmov 0.0   ;;  %vm850_vm0 = vmmov 0   ;;  %v77_v4 = vld [vmem:[#allocation6] sm:$0xff]  ;;  %s851_s3 = smov 32  }
  0x4a   :  { %602 = vmatprep.subr.bf16.mxu0 %v849_v1  ;;  %622 = vmatprep.subr.bf16.mxu1 %v849_v1  ;;  %v693_v5 = vld [vmem:[#allocation9] ss:$16 sps:$4 sm:$0xff]   ;;  %v84_v6 = vld [vmem:[#allocation8] sm:$0xff]  ;;  %vm75_vm2 = vcmask 261120   ;;  %s852_s10 = smov 56   ;;  %v74_v8 = vld [vmem:[#allocation3] sm:$0xff] }
  0x4b   :  { %v69_v2 = vand.u32 127, %v68_v0  ;;  %618 = vmatprep.mubr.msk.bf16.mxu0 %vm850_vm0, %v849_v1  ;;  %638 = vmatprep.mubr.msk.bf16.mxu1 %vm850_vm0, %v849_v1  ;;  %v694_v7 = vld [vmem:[#allocation9 + $0x20] ss:$16 sps:$4 sm:$0xff]   ;;  %v701_v10 = vld [vmem:[#allocation9 + $0x4] ss:$16 sps:$4 sm:$0xff]   ;;  %vm82_vm3 = vcmask 457984  }
  0x4c   :  { %79 = vrot.lane.b32.xlu0 %v77_v4, %s851_s3  ;;  %603 = vmatpush3.bf16.msra.mxu0 %v693_v5  ;;  %v695_v9 = vld [vmem:[#allocation9 + $0x40] ss:$16 sps:$4 sm:$0xff]   ;;  %v702_v12 = vld [vmem:[#allocation9 + $0x24] ss:$16 sps:$4 sm:$0xff]   ;;  %vm89_vm4 = vcmask 589248   ;;  %s853_s1 = smov [#allocation11]  }
  0x4d   :  { %vm70_vm1 = vcmp.eq.s32.totalorder %v69_v2, 72  ;;  %604 = vmatprep.subr.bf16.mxu0 %v849_v1  ;;  %v696_v11 = vld [vmem:[#allocation9 + $0x60] ss:$16 sps:$4 sm:$0xff]   ;;  %623 = vmatpush3.bf16.msra.mxu1 %v701_v10  ;;  %v703_v14 = vld [vmem:[#allocation9 + $0x44] ss:$16 sps:$4 sm:$0xff]   ;;  %s522_s11 = sshll.u32 %s853_s1, 4  ;;  %s523_s11 = int_to_ptr.vmem [resolvable:$true] %s522_s11 }
  0x4e   :  { %v533_v3 = vsel %vm70_vm1, 1.0, %v849_v1  ;;  %624 = vmatprep.subr.bf16.mxu1 %v849_v1  ;;  %v697_v13 = vld [vmem:[#allocation9 + $0x80] ss:$16 sps:$4 sm:$0xff]   ;;  %v704_v16 = vld [vmem:[#allocation9 + $0x64] ss:$16 sps:$4 sm:$0xff]   ;;  %s813_s12 = scalar_lea.vmem %s523_s11, 128  ;;  %p818_p5 = scmp.lt.s32.totalorder %s523_s11, %s523_s11 }
  0x4f   :  { %73 = vst [vmem:[#allocation2] sm:$0xff] %v533_v3  ;;  %v698_v15 = vld [vmem:[#allocation9 + $0xa0] ss:$16 sps:$4 sm:$0xff]   ;;  %v705_v18 = vld [vmem:[#allocation9 + $0x84] ss:$16 sps:$4 sm:$0xff]   ;;  %p814_p4 = scmp.ne.s32.totalorder %s523_s11, %s813_s12  ;;  %p819_p6 = scmp.lt.s32.totalorder %s813_s12, %s813_s12 }
  0x50   :  { %86 = vrot.lane.b32.xlu0 %v84_v6, %s852_s10  ;;  %76 = vst.msk [vmem:[#allocation2] sm:$0xff] %vm75_vm2, %v74_v8  ;;  %605 = vmatpush3.bf16.msra.mxu0 %v694_v7  ;;  %v699_v17 = vld [vmem:[#allocation9 + $0xc0] ss:$16 sps:$4 sm:$0xff]   ;;  %v706_v20 = vld [vmem:[#allocation9 + $0xa4] ss:$16 sps:$4 sm:$0xff]  }
  0x51   :  { %606 = vmatprep.subr.bf16.mxu0 %v849_v1  ;;  %625 = vmatpush3.bf16.msra.mxu1 %v702_v12  ;;  %v700_v19 = vld [vmem:[#allocation9 + $0xe0] ss:$16 sps:$4 sm:$0xff]   ;;  %v707_v21 = vld [vmem:[#allocation9 + $0xc4] ss:$16 sps:$4 sm:$0xff]   ;;  %v709_v27 = vld [vmem:[#allocation9 + $0x8] ss:$16 sps:$4 sm:$0xff]   ;;  %p820_p7 = por %p819_p6, %p818_p5 }
  0x52   :  { %626 = vmatprep.subr.bf16.mxu1 %v849_v1  ;;  %v708_v26 = vld [vmem:[#allocation9 + $0xe4] ss:$16 sps:$4 sm:$0xff]   ;;  %v710_v28 = vld [vmem:[#allocation9 + $0x28] ss:$16 sps:$4 sm:$0xff]   ;;  %v717_v41 = vld [vmem:[#allocation9 + $0xc] ss:$16 sps:$4 sm:$0xff]  }
  0x53   :  { %v711_v29 = vld [vmem:[#allocation9 + $0x48] ss:$16 sps:$4 sm:$0xff]   ;;  %v718_v42 = vld [vmem:[#allocation9 + $0x2c] ss:$16 sps:$4 sm:$0xff]   ;;  %p821_p8 = pnand %p820_p7, %p814_p4 }
  0x54   :  { %607 = vmatpush3.bf16.msra.mxu0 %v695_v9  ;;  %v712_v30 = vld [vmem:[#allocation9 + $0x68] ss:$16 sps:$4 sm:$0xff]   ;;  %v719_v43 = vld [vmem:[#allocation9 + $0x4c] ss:$16 sps:$4 sm:$0xff]  }
  0x55   :  { %608 = vmatprep.subr.bf16.mxu0 %v849_v1  ;;  %627 = vmatpush3.bf16.msra.mxu1 %v703_v14  ;;  %v713_v31 = vld [vmem:[#allocation9 + $0x88] ss:$16 sps:$4 sm:$0xff]   ;;  %v720_v44 = vld [vmem:[#allocation9 + $0x6c] ss:$16 sps:$4 sm:$0xff]  }
  0x56   :  { %628 = vmatprep.subr.bf16.mxu1 %v849_v1  ;;  %v714_v32 = vld [vmem:[#allocation9 + $0xa8] ss:$16 sps:$4 sm:$0xff]   ;;  %v721_v45 = vld [vmem:[#allocation9 + $0x8c] ss:$16 sps:$4 sm:$0xff]  }
  0x57   :  { %v715_v33 = vld [vmem:[#allocation9 + $0xc8] ss:$16 sps:$4 sm:$0xff]   ;;  %v722_v46 = vld [vmem:[#allocation9 + $0xac] ss:$16 sps:$4 sm:$0xff]  }
  0x58   :  { %609 = vmatpush3.bf16.msra.mxu0 %v696_v11  ;;  %v716_v40 = vld [vmem:[#allocation9 + $0xe8] ss:$16 sps:$4 sm:$0xff]   ;;  %v723_v47 = vld [vmem:[#allocation9 + $0xcc] ss:$16 sps:$4 sm:$0xff]  }
  0x59   :  { %610 = vmatprep.subr.bf16.mxu0 %v849_v1  ;;  %629 = vmatpush3.bf16.msra.mxu1 %v704_v16  ;;  %v724_v54 = vld [vmem:[#allocation9 + $0xec] ss:$16 sps:$4 sm:$0xff]  }
  0x5a   :  { %630 = vmatprep.subr.bf16.mxu1 %v849_v1 }
  0x5c   :  { %611 = vmatpush3.bf16.msra.mxu0 %v697_v13 }
  0x5d   :  { %612 = vmatprep.subr.bf16.mxu0 %v849_v1  ;;  %631 = vmatpush3.bf16.msra.mxu1 %v705_v18 }
  0x5e   :  { %632 = vmatprep.subr.bf16.mxu1 %v849_v1 }
  0x60   :  { %613 = vmatpush3.bf16.msra.mxu0 %v698_v15 }
  0x61   :  { %614 = vmatprep.subr.bf16.mxu0 %v849_v1  ;;  %633 = vmatpush3.bf16.msra.mxu1 %v706_v20 }
  0x62   :  { %634 = vmatprep.subr.bf16.mxu1 %v849_v1 }
  0x64   :  { %615 = vmatpush3.bf16.msra.mxu0 %v699_v17 }
  0x65   :  { %616 = vmatprep.subr.bf16.mxu0 %v849_v1  ;;  %635 = vmatpush3.bf16.msra.mxu1 %v707_v21 }
  0x66   :  { %636 = vmatprep.subr.bf16.mxu1 %v849_v1 }
  0x68   :  { %617 = vmatpush3.bf16.msra.mxu0 %v700_v19 }
  0x69   :  { %642 = vmatprep.subr.bf16.mxu0 %v849_v1  ;;  %637 = vmatpush3.bf16.msra.mxu1 %v708_v26 }
  0x6a   :  { %662 = vmatprep.subr.bf16.mxu1 %v849_v1 }
  0xbe   :  { %v80_v22 = vpop.permute.xlu0 %79 }
  0xbf   :  { %83 = vst.msk [vmem:[#allocation2] sm:$0xff] %vm82_vm3, %v80_v22 }
  0xc2   :  { %v87_v23 = vpop.permute.xlu0 %86 }
  0xc3   :  { %90 = vst.msk [vmem:[#allocation2] sm:$0xff] %vm89_vm4, %v87_v23 }
  0xca   :  { %v91_v24 = vld [vmem:[#allocation2] sm:$0xff] }
  0xcb   :  { %v92_v25 = vpack.c.bf16 %v91_v24, %v91_v24 }
  0xcd   :  { %619 = vmatmul.mubr.bf16.vlgmr.msra.gmra.mrb[0].mxu0 %v92_v25 }
  0xce   :  { %658 = vmatprep.mubr.msk.bf16.mxu0 %vm850_vm0, %v849_v1  ;;  %643 = vmatpush3.bf16.msra.mxu0 %v709_v27 }
  0xcf   :  { %644 = vmatprep.subr.bf16.mxu0 %v849_v1 }
  0xd2   :  { %645 = vmatpush3.bf16.msra.mxu0 %v710_v28 }
  0xd3   :  { %646 = vmatprep.subr.bf16.mxu0 %v849_v1 }
  0xd6   :  { %647 = vmatpush3.bf16.msra.mxu0 %v711_v29 }
  0xd7   :  { %648 = vmatprep.subr.bf16.mxu0 %v849_v1 }
  0xda   :  { %649 = vmatpush3.bf16.msra.mxu0 %v712_v30 }
  0xdb   :  { %650 = vmatprep.subr.bf16.mxu0 %v849_v1 }
  0xde   :  { %651 = vmatpush3.bf16.msra.mxu0 %v713_v31 }
  0xdf   :  { %652 = vmatprep.subr.bf16.mxu0 %v849_v1 }
  0xe2   :  { %653 = vmatpush3.bf16.msra.mxu0 %v714_v32 }
  0xe3   :  { %654 = vmatprep.subr.bf16.mxu0 %v849_v1 }
  0xe6   :  { %655 = vmatpush3.bf16.msra.mxu0 %v715_v33 }
  0xe7   :  { %656 = vmatprep.subr.bf16.mxu0 %v849_v1 }
  0xea   :  { %657 = vmatpush3.bf16.msra.mxu0 %v716_v40 }
 0x1a0   :  { %v191_v34 = vpop.f32.mrb[0].mxu0 }
 0x1a1   :  { %v197_v35 = vmax.f32 %v191_v34, 0.0  ;;  %v620_v36 = vpop.f32.mrb[1].mxu0 }
 0x1a2   :  { %v194_v37 = vpop.f32.mrb[2].mxu0 }
 0x1a3   :  { %v198_v38 = vpack.c.bf16 %v197_v35, %v197_v35  ;;  %v621_v39 = vpop.f32.mrb[3].mxu0 }
 0x1a5   :  { %639 = vmatmul.mubr.bf16.vlgmr.msra.gmra.mrb[0].mxu1 %v198_v38 }
 0x1a6   :  { %678 = vmatprep.mubr.msk.bf16.mxu1 %vm850_vm0, %v849_v1  ;;  %663 = vmatpush3.bf16.msra.mxu1 %v717_v41 }
 0x1a7   :  { %664 = vmatprep.subr.bf16.mxu1 %v849_v1 }
 0x1aa   :  { %665 = vmatpush3.bf16.msra.mxu1 %v718_v42 }
 0x1ab   :  { %666 = vmatprep.subr.bf16.mxu1 %v849_v1 }
 0x1ae   :  { %667 = vmatpush3.bf16.msra.mxu1 %v719_v43 }
 0x1af   :  { %668 = vmatprep.subr.bf16.mxu1 %v849_v1 }
 0x1b2   :  { %669 = vmatpush3.bf16.msra.mxu1 %v720_v44 }
 0x1b3   :  { %670 = vmatprep.subr.bf16.mxu1 %v849_v1 }
 0x1b6   :  { %671 = vmatpush3.bf16.msra.mxu1 %v721_v45 }
 0x1b7   :  { %672 = vmatprep.subr.bf16.mxu1 %v849_v1 }
 0x1ba   :  { %673 = vmatpush3.bf16.msra.mxu1 %v722_v46 }
 0x1bb   :  { %674 = vmatprep.subr.bf16.mxu1 %v849_v1 }
 0x1be   :  { %675 = vmatpush3.bf16.msra.mxu1 %v723_v47 }
 0x1bf   :  { %676 = vmatprep.subr.bf16.mxu1 %v849_v1 }
 0x1c2   :  { %677 = vmatpush3.bf16.msra.mxu1 %v724_v54 }
 0x278   :  { %v297_v48 = vpop.f32.mrb[0].mxu1 }
 0x279   :  { %v303_v49 = vmax.f32 %v297_v48, 0.0  ;;  %v640_v50 = vpop.f32.mrb[1].mxu1 }
 0x27a   :  { %v300_v51 = vpop.f32.mrb[2].mxu1 }
 0x27b   :  { %v304_v52 = vpack.c.bf16 %v303_v49, %v303_v49  ;;  %v641_v53 = vpop.f32.mrb[3].mxu1 }
 0x27d   :  { %659 = vmatmul.mubr.bf16.vlgmr.msra.gmra.mrb[4].mxu0 %v304_v52 }
 0x350   :  { %v403_v55 = vpop.f32.mrb[4].mxu0 }
 0x351   :  { %v409_v56 = vmax.f32 %v403_v55, 0.0  ;;  %v660_v57 = vpop.f32.mrb[5].mxu0 }
 0x352   :  { %v406_v58 = vpop.f32.mrb[6].mxu0 }
 0x353   :  { %v410_v59 = vpack.c.bf16 %v409_v56, %v409_v56  ;;  %v661_v60 = vpop.f32.mrb[7].mxu0 }
 0x355   :  { %679 = vmatmul.mubr.bf16.vlgmr.msra.gmra.mrb[4].mxu1 %v410_v59 }
 0x428   :  { %v509_v61 = vpop.f32.mrb[4].mxu1 }
 0x429   :  { %515 = vst [vmem:[#allocation11] sm:$0xff] %v509_v61  ;;  %v680_v62 = vpop.f32.mrb[5].mxu1 }
 0x42a   :  { %v512_v63 = vpop.f32.mrb[6].mxu1 }
 0x42b   :  { %824 = shalt.err (!%p821_p8)
}
 0x42c   :  { %s825_s15 = scalar_lea.hbm %s991_s4, 128 }
 0x42d   :  { %p826_p9 = scmp.ne.s32.totalorder %s991_s4, %s825_s15  ;;  %p829_p10 = scmp.lt.u32.totalorder %s825_s15, %s991_s4 }
 0x42f   :  { %p831_p11 = pnand %p829_p10, %p826_p9 }
 0x431   :  { %834 = shalt.err (!%p831_p11)
}
 0x432   :  { %525 = dma.vmem_to_hbm [thread:$0]  %s523_s11, 128, %s991_s4, [#allocation5]   ;;  %v681_v0 = vpop.f32.mrb[7].mxu1 }
 0x433   :  { %841 = dma.done.wait [#allocation5], 128  }
 0x434   :  { %842 = vsyncadd [#allocation5], 4294967168 }
 0x435   :  { %529 = vsyncpa [#allocation4], 1 }
 0x436   :  { %530 = vsyncpa [#allocation7], 1 }
 0x437   :  { %531 = vsyncpa [#allocation10], 1 }
 0x438   :  { %532 = vsyncpa [#allocation5], 1 }

</bundles_post_ra>
